<compile_context>
chip_gen: v7x
topology: tpu7x:2x2x1
jax: 0.10.0
libtpu: 0.0.40
codegen_flags: <defaults>
</compile_context>

<pallas_src>
from functools import partial

import numpy as np
import jax
import jax.numpy as jnp
from jax.experimental import pallas as pl
from jax.experimental.pallas import tpu as pltpu


_GROUPS = 32
_EPS = 1e-5
_ACT_DTYPE = jnp.bfloat16      # activations / conv weights in HBM
_NB_BUDGET = 12 << 20          # budget used when deciding to merge the batch


# ---------------------------------------------------------------------------
# in-kernel helpers
# ---------------------------------------------------------------------------
def _gn_silu_2d(xs, gamma, beta, groups, eps):
    """GroupNorm(groups) + SiLU on a (H*W, C) f32 tile (two-pass variance)."""
    HW, C = xs.shape
    cg = C // groups
    # (C, G) and (G, C) group-indicator matrices built from iota + compares
    # (no integer division, no resident CxC buffer).
    ci = jax.lax.broadcasted_iota(jnp.int32, (C, groups), 0)
    gi = jax.lax.broadcasted_iota(jnp.int32, (C, groups), 1)
    P = jnp.where((ci >= gi * cg) & (ci < (gi + 1) * cg), 1.0, 0.0)
    cit = jax.lax.broadcasted_iota(jnp.int32, (groups, C), 1)
    git = jax.lax.broadcasted_iota(jnp.int32, (groups, C), 0)
    PT = jnp.where((cit >= git * cg) & (cit < (git + 1) * cg), 1.0, 0.0)
    nelem = float(HW * cg)
    s = jnp.sum(xs, axis=0, keepdims=True)                  # (1, C)
    mean = jnp.dot(jnp.dot(s, P), PT) / nelem               # per-group -> per-channel
    d = xs - mean
    v = jnp.sum(d * d, axis=0, keepdims=True)               # (1, C)
    var = jnp.dot(jnp.dot(v, P), PT) / nelem
    y = d * jax.lax.rsqrt(var + eps) * gamma + beta
    return y * jax.nn.sigmoid(y)                            # SiLU


def _conv3x3_from_pad(pad_ref, w_ref, NB, H, W, Cin, Cout):
    """3x3 / stride-1 conv from a zero-padded (NB, H+2, W+2, Cin) ref.

    The 9 shifted views are taken in VMEM, lane-stacked into a (rows*W, 9*Cin)
    bf16 operand and contracted with one K=9*Cin matmul per row chunk (chunking
    bounds the VMEM temporaries).  Returns (NB, H, W, Cout) f32.
    """
    w = w_ref[...]
    row_bytes = max(1, NB * W * 9 * Cin * 2)
    rows = max(1, min(H, (1 << 20) // row_bytes))
    chunks = []
    for r0 in range(0, H, rows):
        rr = min(rows, H - r0)
        taps = [pad_ref[:, r0 + dy:r0 + dy + rr, dx:dx + W, :]
                for dy in range(3) for dx in range(3)]
        a = jnp.concatenate(taps, axis=-1).astype(jnp.bfloat16)
        a = a.reshape(NB * rr * W, 9 * Cin)
        o = jnp.dot(a, w, preferred_element_type=jnp.float32)
        chunks.append(o.reshape(NB, rr, W, Cout))
    return chunks[0] if len(chunks) == 1 else jnp.concatenate(chunks, axis=1)


# ---------------------------------------------------------------------------
# Pallas kernels
# ---------------------------------------------------------------------------
def _matmul_conv_kernel(x_ref, w_ref, b_ref, o_ref):
    # x: (NB, H, W, K) bf16; w: (K, Cout) bf16; b: (1, Cout) f32.
    NB, H, W, K = x_ref.shape
    Cout = o_ref.shape[-1]
    a = x_ref[...].reshape(NB * H * W, K)
    acc = jnp.dot(a, w_ref[...], preferred_element_type=jnp.float32) + b_ref[...]
    o_ref[...] = acc.reshape(NB, H, W, Cout).astype(o_ref.dtype)


def _conv3x3_kernel(xp_ref, w_ref, b_ref, o_ref):
    # xp: (NB, H+2, W+2, Cin) zero-padded activation (padded once in JAX).
    NB, Hp, Wp, Cin = xp_ref.shape
    H, W = Hp - 2, Wp - 2
    Cout = o_ref.shape[-1]
    out = _conv3x3_from_pad(xp_ref, w_ref, NB, H, W, Cin, Cout) + b_ref[...]
    o_ref[...] = out.astype(o_ref.dtype)


def _rb_kernel(x_ref, g1_ref, b1_ref, w1_ref, cb1_ref,
               g2_ref, b2_ref, w2_ref, cb2_ref, *rest,
               groups, eps, has_skip):
    """Fused RB: GN+SiLU -> 3x3 conv -> GN+SiLU -> 3x3 conv -> + skip."""
    if has_skip:
        sw_ref, sb_ref, o_ref, pad1_ref, pad2_ref = rest
    else:
        o_ref, pad1_ref, pad2_ref = rest
    NB, H, W, Cin = x_ref.shape
    Cout = o_ref.shape[-1]

    xb = x_ref[...]                                          # bf16 (NB,H,W,Cin)

    # --- GroupNorm(32, Cin) + SiLU into zero-padded scratch ---
    pad1_ref[...] = jnp.zeros(pad1_ref.shape, pad1_ref.dtype)
    for si in range(NB):
        xs = xb[si].reshape(H * W, Cin).astype(jnp.float32)
        y = _gn_silu_2d(xs, g1_ref[...], b1_ref[...], groups, eps)
        pad1_ref[si, 1:H + 1, 1:W + 1, :] = y.reshape(H, W, Cin)

    # --- conv1: 3x3, single K=9*Cin matmul per row chunk ---
    h = _conv3x3_from_pad(pad1_ref, w1_ref, NB, H, W, Cin, Cout) + cb1_ref[...]

    # --- GroupNorm(32, Cout) + SiLU on conv1's output (kept in VMEM) ---
    pad2_ref[...] = jnp.zeros(pad2_ref.shape, pad2_ref.dtype)
    for si in range(NB):
        hs = h[si].reshape(H * W, Cout)
        y = _gn_silu_2d(hs, g2_ref[...], b2_ref[...], groups, eps)
        pad2_ref[si, 1:H + 1, 1:W + 1, :] = y.reshape(H, W, Cout)

    # --- conv2 + fused skip (identity or 1x1 conv) ---
    out = _conv3x3_from_pad(pad2_ref, w2_ref, NB, H, W, Cout, Cout) + cb2_ref[...]
    if has_skip:
        skip = jnp.dot(xb.reshape(NB * H * W, Cin), sw_ref[...],
                       preferred_element_type=jnp.float32) + sb_ref[...]
        skip = skip.reshape(NB, H, W, Cout)
    else:
        skip = xb.astype(jnp.float32)                        # Cin == Cout
    o_ref[...] = (out + skip).astype(o_ref.dtype)


# ---------------------------------------------------------------------------
# Pallas wrappers (jitted; identical shapes reuse compiled kernels)
# ---------------------------------------------------------------------------
def _pick_nb(n, per_sample_bytes):
    # Merge the whole batch into one block (M = N*H*W) when it fits the budget.
    return n if n * per_sample_bytes <= _NB_BUDGET else 1


def _compiler_params(block_bytes):
    vmem = int(min(48 << 20, max(32 << 20, 3 * block_bytes)))
    return pltpu.CompilerParams(dimension_semantics=("parallel",),
                                vmem_limit_bytes=vmem)


def _nbytes(a):
    return int(a.size) * a.dtype.itemsize


@jax.jit
def _conv_matmul_call(x, w, b):
    N, H, W, K = x.shape
    Cout = w.shape[-1]
    per = H * W * (K * 2 + Cout * 8)
    nb = _pick_nb(N, per)
    blk = nb * per + _nbytes(w) + _nbytes(b)
    return pl.pallas_call(
        _matmul_conv_kernel,
        out_shape=jax.ShapeDtypeStruct((N, H, W, Cout), _ACT_DTYPE),
        grid=(N // nb,),
        in_specs=[pl.BlockSpec((nb, H, W, K), lambda n: (n, 0, 0, 0)),
                  pl.BlockSpec((K, Cout), lambda n: (0, 0)),
                  pl.BlockSpec((1, Cout), lambda n: (0, 0))],
        out_specs=pl.BlockSpec((nb, H, W, Cout), lambda n: (n, 0, 0, 0)),
        compiler_params=_compiler_params(blk),
        cost_estimate=pl.CostEstimate(
            flops=2 * N * H * W * K * Cout, transcendentals=0,
            bytes_accessed=_nbytes(x) + _nbytes(w) + _nbytes(b) + N * H * W * Cout * 2),
    )(x, w, b)


@jax.jit
def _conv3x3_pad_call(xp, w, b):
    N, Hp, Wp, Cin = xp.shape
    H, W = Hp - 2, Wp - 2
    Cout = w.shape[-1]
    per = Hp * Wp * Cin * 2 + H * W * Cout * 8
    nb = _pick_nb(N, per)
    blk = nb * per + _nbytes(w) + _nbytes(b) + (2 << 20)
    return pl.pallas_call(
        _conv3x3_kernel,
        out_shape=jax.ShapeDtypeStruct((N, H, W, Cout), _ACT_DTYPE),
        grid=(N // nb,),
        in_specs=[pl.BlockSpec((nb, Hp, Wp, Cin), lambda n: (n, 0, 0, 0)),
                  pl.BlockSpec((9 * Cin, Cout), lambda n: (0, 0)),
                  pl.BlockSpec((1, Cout), lambda n: (0, 0))],
        out_specs=pl.BlockSpec((nb, H, W, Cout), lambda n: (n, 0, 0, 0)),
        compiler_params=_compiler_params(blk),
        cost_estimate=pl.CostEstimate(
            flops=2 * N * H * W * 9 * Cin * Cout, transcendentals=0,
            bytes_accessed=_nbytes(xp) + _nbytes(w) + _nbytes(b) + N * H * W * Cout * 2),
    )(xp, w, b)


def _rb_pallas(x, g1, b1, w1, cb1, g2, b2, w2, cb2, sw, sb):
    N, H, W, Cin = x.shape
    Cout = w1.shape[-1]
    has_skip = sw is not None
    per = (H * W * (Cin + Cout) * 2                       # in/out blocks (bf16)
           + (H + 2) * (W + 2) * (Cin + Cout) * 4         # padded f32 scratches
           + H * W * (Cin + Cout) * 8)                    # f32 temporaries
    nb = _pick_nb(N, per)
    kern = partial(_rb_kernel, groups=_GROUPS, eps=_EPS, has_skip=has_skip)
    in_specs = [
        pl.BlockSpec((nb, H, W, Cin), lambda n: (n, 0, 0, 0)),
        pl.BlockSpec((1, Cin), lambda n: (0, 0)),
        pl.BlockSpec((1, Cin), lambda n: (0, 0)),
        pl.BlockSpec((9 * Cin, Cout), lambda n: (0, 0)),
        pl.BlockSpec((1, Cout), lambda n: (0, 0)),
        pl.BlockSpec((1, Cout), lambda n: (0, 0)),
        pl.BlockSpec((1, Cout), lambda n: (0, 0)),
        pl.BlockSpec((9 * Cout, Cout), lambda n: (0, 0)),
        pl.BlockSpec((1, Cout), lambda n: (0, 0)),
    ]
    args = [x, g1, b1, w1, cb1, g2, b2, w2, cb2]
    if has_skip:
        in_specs += [pl.BlockSpec((Cin, Cout), lambda n: (0, 0)),
                     pl.BlockSpec((1, Cout), lambda n: (0, 0))]
        args += [sw, sb]
    scratch = [pltpu.VMEM((nb, H + 2, W + 2, Cin), jnp.float32),
               pltpu.VMEM((nb, H + 2, W + 2, Cout), jnp.float32)]
    flops = 2 * N * H * W * (9 * Cin * Cout + 9 * Cout * Cout
                             + (Cin * Cout if has_skip else 0))
    return pl.pallas_call(
        kern,
        out_shape=jax.ShapeDtypeStruct((N, H, W, Cout), _ACT_DTYPE),
        grid=(N // nb,),
        in_specs=in_specs,
        out_specs=pl.BlockSpec((nb, H, W, Cout), lambda n: (n, 0, 0, 0)),
        scratch_shapes=scratch,
        compiler_params=_compiler_params(nb * per + _nbytes(w1) + _nbytes(w2)),
        cost_estimate=pl.CostEstimate(
            flops=flops, transcendentals=N * H * W * (Cin + Cout),
            bytes_accessed=sum(_nbytes(a) for a in args) + N * H * W * Cout * 2),
    )(*args)


@jax.jit
def _rb_call_noskip(x, g1, b1, w1, cb1, g2, b2, w2, cb2):
    return _rb_pallas(x, g1, b1, w1, cb1, g2, b2, w2, cb2, None, None)


@jax.jit
def _rb_call_skip(x, g1, b1, w1, cb1, g2, b2, w2, cb2, sw, sb):
    return _rb_pallas(x, g1, b1, w1, cb1, g2, b2, w2, cb2, sw, sb)


# ---------------------------------------------------------------------------
# JAX-side glue
# ---------------------------------------------------------------------------
def _stack_patches(x, k, stride):
    """im2col with taps lane-stacked along channels -> (N, Ho, Wo, k*k*Cin).
    Only used for stride-2 convs and the tiny-Cin stem; stride-1 3x3 convs keep
    the activation un-expanded and form taps inside the kernel."""
    xp = jnp.pad(x, ((0, 0), (1, 1), (1, 1), (0, 0)))
    H, W = x.shape[1], x.shape[2]
    Ho = (H + 2 - k) // stride + 1
    Wo = (W + 2 - k) // stride + 1
    taps = [xp[:, dy:dy + stride * (Ho - 1) + 1:stride,
               dx:dx + stride * (Wo - 1) + 1:stride, :]
            for dy in range(k) for dx in range(k)]
    return jnp.concatenate(taps, axis=-1)


def conv2d(x, p, stride=1):
    w, b, k = p["w"], p["b"], p["k"]
    cout = w.shape[-1]
    lane_pad = 128 - cout if cout < 8 else 0        # keep 1-channel heads lane-dense
    if lane_pad:
        w = jnp.pad(w, ((0, 0), (0, lane_pad)))
        b = jnp.pad(b, ((0, 0), (0, lane_pad)))
    if k == 1 and stride == 1:
        out = _conv_matmul_call(x, w, b)
    elif stride == 1 and x.shape[-1] >= 8:
        xp = jnp.pad(x, ((0, 0), (1, 1), (1, 1), (0, 0)))
        out = _conv3x3_pad_call(xp, w, b)
    else:
        out = _conv_matmul_call(_stack_patches(x, k, stride), w, b)
    return out[..., :cout] if lane_pad else out


def rb_forward(x, p):
    a = (x, p["gn1"]["g"], p["gn1"]["b"], p["conv1"]["w"], p["conv1"]["b"],
         p["gn2"]["g"], p["gn2"]["b"], p["conv2"]["w"], p["conv2"]["b"])
    if "skip" in p:
        return _rb_call_skip(*a, p["skip"]["w"], p["skip"]["b"])
    return _rb_call_noskip(*a)


def up2_nearest(x):
    return jnp.repeat(jnp.repeat(x, 2, axis=1), 2, axis=2)


def up_to(x, size):
    factor = size // x.shape[1]
    return jnp.repeat(jnp.repeat(x, factor, axis=1), factor, axis=2)


# ---------------------------------------------------------------------------
# Deterministic parameter construction
# ---------------------------------------------------------------------------
class ParamGen:
    def __init__(self, seed=0):
        self._key = jax.random.PRNGKey(seed)
        self._i = 0

    def _take(self):
        self._i += 1
        return jax.random.fold_in(self._key, self._i)

    def conv(self, cin, cout, k):
        w = jax.random.normal(self._take(), (k, k, cin, cout), jnp.float32)
        w = w / np.sqrt(k * k * cin)
        return {"w": w.reshape(k * k * cin, cout).astype(_ACT_DTYPE),
                "b": jnp.zeros((1, cout), jnp.float32), "k": k}

    def gn(self, c):
        return {"g": jnp.ones((1, c), jnp.float32),
                "b": jnp.zeros((1, c), jnp.float32)}

    def rb(self, cin, cout):
        p = {"gn1": self.gn(cin), "conv1": self.conv(cin, cout, 3),
             "gn2": self.gn(cout), "conv2": self.conv(cout, cout, 3)}
        if cin != cout:
            p["skip"] = self.conv(cin, cout, 1)
        return p


# ---------------------------------------------------------------------------
# FCB (U-Net of RB blocks) — matches the PyTorch default configuration
# ---------------------------------------------------------------------------
def build_fcb(pg, in_channels=3, mlc=32, mults=(1, 1, 2, 2, 4, 4),
              nd=6, nu=6, n_rbs=2):
    enc = [("conv", pg.conv(in_channels, mlc, 3))]
    ch = mlc
    chans = [mlc]
    for level in range(nd):
        m = mults[level]
        for _ in range(n_rbs):
            enc.append(("rb", pg.rb(ch, m * mlc)))
            ch = m * mlc
            chans.append(ch)
        if level != nd - 1:
            enc.append(("down", pg.conv(ch, ch, 3)))
            chans.append(ch)
    mid = [pg.rb(ch, ch), pg.rb(ch, ch)]
    dec = []
    rev = list(mults)[::-1]
    for level in range(nu):
        m = rev[level]
        for block in range(n_rbs + 1):
            icin = ch + chans.pop()
            entry = {"rb": pg.rb(icin, m * mlc)}
            ch = m * mlc
            if level < nu - 1 and block == n_rbs:
                entry["up"] = pg.conv(ch, ch, 3)
            dec.append(entry)
    return {"enc": enc, "mid": mid, "dec": dec}


def fcb_forward(x, p):
    hs = []
    h = x
    for kind, q in p["enc"]:
        if kind == "conv":
            h = conv2d(h, q)
        elif kind == "rb":
            h = rb_forward(h, q)
        else:                       # stride-2 downsample conv
            h = conv2d(h, q, stride=2)
        hs.append(h)
    for q in p["mid"]:
        h = rb_forward(h, q)
    for entry in p["dec"]:
        h = jnp.concatenate([h, hs.pop()], axis=-1)
        h = rb_forward(h, entry["rb"])
        if "up" in entry:
            h = up2_nearest(h)
            h = conv2d(h, entry["up"])
    return h


# ---------------------------------------------------------------------------
# TB branch
# TODO(synk): TB wraps a BiFormer backbone loaded from 'biformer_base_best.pth'
# plus ComplexSAPblock / ESA_blcok whose definitions & weights are not provided;
# it is replaced by a small deterministic surrogate producing the same interface
# (64-channel feature map at size/4, later upsampled to `size`).
# ---------------------------------------------------------------------------
def build_tb_stub(pg):
    return {"c1": pg.conv(3, 64, 3), "rb1": pg.rb(64, 64),
            "c2": pg.conv(64, 64, 3), "rb2": pg.rb(64, 64)}


def tb_stub_forward(x, p):
    h = conv2d(x, p["c1"], stride=2)
    h = rb_forward(h, p["rb1"])
    h = conv2d(h, p["c2"], stride=2)
    h = rb_forward(h, p["rb2"])
    return h                         # (N, size/4, size/4, 64)


# ---------------------------------------------------------------------------
# FCBFormer
# ---------------------------------------------------------------------------
def build_fcbformer(size=32, seed=0):
    assert size % 32 == 0, "size must be a multiple of 32 (5 stride-2 downsamples)"
    pg = ParamGen(seed)
    return {
        "size": size,
        "tb": build_tb_stub(pg),
        "fcb": build_fcb(pg),
        "ph1": pg.conv(96, 1, 1),          # self.ph1
        "PH1": pg.rb(96, 64),              # self.PH1
        "PH2_rb": pg.rb(64, 64),           # self.PH2[0]
        "PH2_conv": pg.conv(64, 1, 1),     # self.PH2[1]
    }


def fcbformer_forward(x_nchw, params):
    # Layout: NCHW in/out (PyTorch convention), NHWC bf16 internally.
    x = jnp.transpose(x_nchw, (0, 2, 3, 1)).astype(_ACT_DTYPE)
    x1 = tb_stub_forward(x, params["tb"])                  # TB branch (surrogate)
    x2 = fcb_forward(x, params["fcb"])                     # FCB branch -> 32 ch
    x1 = up_to(x1, params["size"])                         # nn.Upsample(size=size)
    xc = jnp.concatenate([x1, x2], axis=-1)                # cat dim=1 -> 96 ch
    x3 = conv2d(xc, params["ph1"])                         # self.ph1 (1x1 -> 1)
    out = rb_forward(xc, params["PH1"])                    # RB(96, 64)
    # TODO(synk): ESA_blcok(dim=64) definition not provided; esa(out, x3) is
    # skipped (identity on `out`); x3 is still computed as in the reference.
    del x3
    out = rb_forward(out, params["PH2_rb"])                # RB(64, 64)
    out = conv2d(out, params["PH2_conv"])                  # 1x1 -> 1
    out = jnp.transpose(out.astype(jnp.float32), (0, 3, 1, 2))   # back to NCHW
    return out, out, out, out


# ---------------------------------------------------------------------------
if __name__ == "__main__":
    size = 32   # smallest size valid for the 5 stride-2 downsamples in FCB
    params = build_fcbformer(size=size, seed=0)
    x = jax.random.normal(jax.random.PRNGKey(0), (2, 3, size, size), jnp.float32)
    outs = fcbformer_forward(x, params)
    outs = jax.block_until_ready(outs)
    assert outs[0].shape == (2, 1, size, size)
    print("KERNEL_OK")
</pallas_src>

<mosaic_0001>
module attributes {stable_mosaic.version = 11 : i64} {
  func.func @_matmul_conv_kernel(%arg0: i32, %arg1: memref<2x16x16x27xbf16, #tpu.memory_space<vmem>>, %arg2: memref<27x64xbf16, #tpu.memory_space<vmem>>, %arg3: memref<1x64xf32, #tpu.memory_space<vmem>>, %arg4: memref<2x16x16x64xbf16, #tpu.memory_space<vmem>>) attributes {dimension_semantics = [#tpu.dimension_semantics<parallel>], iteration_bounds = array<i64: 1>, scalar_prefetch = 0 : i64, scratch_operands = 0 : i64, tpu.core_type = #tpu.core_type<tc>, window_params = [{transform_indices = @transform_0, window_bounds = array<i64: 2, 16, 16, 27>}, {pipeline_mode = #tpu.pipeline_mode<synchronous>, transform_indices = @transform_1, window_bounds = array<i64: 27, 64>}, {pipeline_mode = #tpu.pipeline_mode<synchronous>, transform_indices = @transform_2, window_bounds = array<i64: 1, 64>}, {transform_indices = @transform_3, window_bounds = array<i64: 2, 16, 16, 64>}]} {
    %c0 = arith.constant 0 : index
    %c0_0 = arith.constant 0 : index
    %c0_1 = arith.constant 0 : index
    %c0_2 = arith.constant 0 : index
    %0 = vector.load %arg1[%c0, %c0_0, %c0_1, %c0_2] : memref<2x16x16x27xbf16, #tpu.memory_space<vmem>>, vector<2x16x16x27xbf16>
    %1 = vector.shape_cast %0 : vector<2x16x16x27xbf16> to vector<512x27xbf16>
    %c0_3 = arith.constant 0 : index
    %c0_4 = arith.constant 0 : index
    %2 = vector.load %arg2[%c0_3, %c0_4] : memref<27x64xbf16, #tpu.memory_space<vmem>>, vector<27x64xbf16>
    %cst = arith.constant dense<0.000000e+00> : vector<512x64xf32>
    %3 = tpu.matmul %1, %2, %cst {dimension_numbers = #tpu.dot_dimension_numbers<[1], [0], [0], [1], [0, 0, 1, 1], [], []>} : vector<512x27xbf16>, vector<27x64xbf16>, vector<512x64xf32> -> vector<512x64xf32>
    %c0_5 = arith.constant 0 : index
    %c0_6 = arith.constant 0 : index
    %4 = vector.load %arg3[%c0_5, %c0_6] : memref<1x64xf32, #tpu.memory_space<vmem>>, vector<1x64xf32>
    %5 = vector.broadcast %4 : vector<1x64xf32> to vector<512x64xf32>
    %6 = arith.addf %3, %5 : vector<512x64xf32>
    %7 = vector.shape_cast %6 : vector<512x64xf32> to vector<2x16x16x64xf32>
    %8 = arith.truncf %7 : vector<2x16x16x64xf32> to vector<2x16x16x64xbf16>
    %c0_7 = arith.constant 0 : index
    %c0_8 = arith.constant 0 : index
    %c0_9 = arith.constant 0 : index
    %c0_10 = arith.constant 0 : index
    %9 = vector.load %arg4[%c0_7, %c0_8, %c0_9, %c0_10] : memref<2x16x16x64xbf16, #tpu.memory_space<vmem>>, vector<2x16x16x64xbf16>
    tpu.vector_store %arg4[%c0_7, %c0_8, %c0_9, %c0_10], %8 {strides = array<i32>} : memref<2x16x16x64xbf16, #tpu.memory_space<vmem>>, vector<2x16x16x64xbf16>,
    return
  }
  func.func @transform_0(%arg0: i32) -> (i32, i32, i32, i32) {
    %c0_i32 = arith.constant 0 : i32
    %c0_i32_0 = arith.constant 0 : i32
    %c0_i32_1 = arith.constant 0 : i32
    %c0_i32_2 = arith.constant 0 : i32
    return %arg0, %c0_i32, %c0_i32_0, %c0_i32_1 : i32, i32, i32, i32
  }
  func.func @transform_1(%arg0: i32) -> (i32, i32) {
    %c0_i32 = arith.constant 0 : i32
    %c0_i32_0 = arith.constant 0 : i32
    %c0_i32_1 = arith.constant 0 : i32
    return %c0_i32, %c0_i32_0 : i32, i32
  }
  func.func @transform_2(%arg0: i32) -> (i32, i32) {
    %c0_i32 = arith.constant 0 : i32
    %c0_i32_0 = arith.constant 0 : i32
    %c0_i32_1 = arith.constant 0 : i32
    return %c0_i32, %c0_i32_0 : i32, i32
  }
  func.func @transform_3(%arg0: i32) -> (i32, i32, i32, i32) {
    %c0_i32 = arith.constant 0 : i32
    %c0_i32_0 = arith.constant 0 : i32
    %c0_i32_1 = arith.constant 0 : i32
    %c0_i32_2 = arith.constant 0 : i32
    return %arg0, %c0_i32, %c0_i32_0, %c0_i32_1 : i32, i32, i32, i32
  }
}

</mosaic_0001>

<bundles_post_ra>
// kernel: _conv_matmul_call.1
= control target key start
LH: loop header
LB: loop body
LE: loop exit
PB: predicated region body
PF: predicated region fallthrough
CT: control target
= control target key end

     0   :  { %8 = vsyncpa [#allocation3], 0  ;;  %s1671_s0 = inlined_call_operand.hbm [shape: bf16[2,16,16,27], index: 0, kind: input, shape index: {}]   ;;  %s1672_s1 = inlined_call_operand.hbm [shape: bf16[27,64], index: 1, kind: input, shape index: {}]   ;;  %s1673_s2 = inlined_call_operand.vmem [shape: f32[1,64], index: 2, kind: input, shape index: {}]   ;;  %s1674_s3 = inlined_call_operand.hbm [shape: bf16[2,16,16,64], index: 3, kind: output, shape index: {}]  }
   0x1   :  { %9 = vsyncpa [#allocation6], 0 }
   0x2   :  { %10 = vsyncpa [#allocation4], 0  ;;  %s1435_s12 = smov [#allocation2]   ;;  %s1363_s16 = scalar_lea.hbm %s1671_s0, 4096 }
   0x3   :  { %s16_s13 = sshll.u32 %s1435_s12, 4  ;;  %p1364_p0 = scmp.ne.s32.totalorder %s1671_s0, %s1363_s16  ;;  %s17_s13 = int_to_ptr.vmem [resolvable:$true] %s16_s13 }
   0x4   :  { %p1367_p1 = scmp.lt.u32.totalorder %s1363_s16, %s1671_s0 }
   0x6   :  { %p1369_p2 = pnand %p1367_p1, %p1364_p0 }
   0x8   :  { %1372 = shalt.err (!%p1369_p2)
}
   0x9   :  { %s1373_s21 = scalar_lea.vmem %s17_s13, 4096  ;;  %p1378_p4 = scmp.lt.s32.totalorder %s17_s13, %s17_s13 }
   0xa   :  { %p1374_p3 = scmp.ne.s32.totalorder %s17_s13, %s1373_s21  ;;  %p1379_p5 = scmp.lt.s32.totalorder %s1373_s21, %s1373_s21 }
   0xc   :  { %p1380_p6 = por %p1379_p5, %p1378_p4 }
   0xe   :  { %p1381_p7 = pnand %p1380_p6, %p1374_p3 }
  0x10   :  { %1384 = shalt.err (!%p1381_p7)
}
  0x11   :  { %s1436_s22 = smov 64   ;;  %s1437_s23 = smov 4  }
  0x12   :  { %22 = dma.hbm_to_vmem [thread:$0]  %s1671_s0, 4096, %s17_s13, [#allocation3], %s1436_s22, %s1436_s22, %s1437_s23  }
  0x13   :  { %s1438_s26 = smov [#allocation5]   ;;  %s1385_s30 = scalar_lea.hbm %s1672_s1, 256 }
  0x14   :  { %s28_s27 = sshll.u32 %s1438_s26, 4  ;;  %p1386_p8 = scmp.ne.s32.totalorder %s1672_s1, %s1385_s30  ;;  %s29_s27 = int_to_ptr.vmem [resolvable:$true] %s28_s27 }
  0x15   :  { %p1389_p9 = scmp.lt.u32.totalorder %s1385_s30, %s1672_s1 }
  0x17   :  { %p1391_p10 = pnand %p1389_p9, %p1386_p8 }
  0x19   :  { %1394 = shalt.err (!%p1391_p10)
}
  0x1a   :  { %s1395_s8 = scalar_lea.vmem %s29_s27, 256  ;;  %p1400_p12 = scmp.lt.s32.totalorder %s29_s27, %s29_s27 }
  0x1b   :  { %p1396_p11 = scmp.ne.s32.totalorder %s29_s27, %s1395_s8  ;;  %p1401_p13 = scmp.lt.s32.totalorder %s1395_s8, %s1395_s8 }
  0x1d   :  { %p1402_p0 = por %p1401_p13, %p1400_p12 }
  0x1f   :  { %p1403_p1 = pnand %p1402_p0, %p1396_p11 }
  0x21   :  { %1406 = shalt.err (!%p1403_p1)
}
  0x22   :  { %34 = dma.hbm_to_vmem [thread:$0]  %s1672_s1, 256, %s29_s27, [#allocation6], %s1436_s22, %s1436_s22, %s1437_s23  }
  0x23   :  { %1429 = dma.done.wait [#allocation3], 4096  }
  0x24   :  { %1430 = vsyncadd [#allocation3], 4294963200 }
  0x25   :  { %1431 = dma.done.wait [#allocation6], 256  }
  0x26   :  { %1432 = vsyncadd [#allocation6], 4294967040  ;;  %vm387_vm0 = vcmask 1044480   ;;  %vm388_vm1 = vcmask 1045504   ;;  %v1439_v0 = vmov 65535   ;;  %vm290_vm2 = vcmask 220160  }
  0x27   :  { %v389_v1 = vsel %vm387_vm0, 4294967295, %v1439_v0  ;;  %v1329_v2 = vld [vmem:[#allocation5] sm:$0xff]   ;;  %v1330_v4 = vld [vmem:[#allocation5 + $0x8] sm:$0x3f]   ;;  %v1335_v10 = vld [vmem:[#allocation2 + $0x10] sm:$0xff]   ;;  %vm939_vm3 = vcmask 519168  }
  0x28   :  { %v390_v3 = vsel %vm388_vm1, %v389_v1, 0  ;;  %1251 = vmatprep.subr.bf16.mxu0 %v1329_v2  ;;  %1319 = vmatprep.subr.bf16.mxu1 %v1329_v2  ;;  %v1331_v5 = vld [vmem:[#allocation2] sm:$0xff]   ;;  %v1333_v8 = vld [vmem:[#allocation2 + $0x8] sm:$0xff]   ;;  %v1336_v11 = vld [vmem:[#allocation2 + $0x90] sm:$0xff]  }
  0x29   :  { %1252 = vmatpush3.bf16.msra.mxu0 %v1329_v2  ;;  %1321 = vmatpush3.bf16.msra.mxu1 %v1329_v2  ;;  %v392_v6 = vand.u32 %v1330_v4, %v390_v3  ;;  %v1332_v7 = vld [vmem:[#allocation2 + $0x80] sm:$0xff]   ;;  %v1334_v9 = vld [vmem:[#allocation2 + $0x88] sm:$0xff]   ;;  %v1337_v12 = vld [vmem:[#allocation2 + $0x18] sm:$0xff]  }
  0x2a   :  { %1255 = vmatprep.mubr.msk.bf16.mxu0 %vm290_vm2, %v1331_v5  ;;  %1287 = vmatprep.mubr.msk.bf16.mxu1 %vm290_vm2, %v1332_v7  ;;  %v1338_v13 = vld [vmem:[#allocation2 + $0x98] sm:$0xff]   ;;  %v1339_v14 = vld [vmem:[#allocation2 + $0x20] sm:$0xff]   ;;  %v1341_v16 = vld [vmem:[#allocation2 + $0x28] sm:$0xff]  }
  0x2b   :  { %1253 = vmatprep.subr.bf16.mxu0 %v392_v6  ;;  %1320 = vmatprep.subr.bf16.mxu1 %v392_v6  ;;  %v1340_v15 = vld [vmem:[#allocation2 + $0xa0] sm:$0xff]   ;;  %v1342_v17 = vld [vmem:[#allocation2 + $0xa8] sm:$0xff]   ;;  %v1343_v18 = vld [vmem:[#allocation2 + $0x30] sm:$0xff]  }
  0x2c   :  { %v1344_v19 = vld [vmem:[#allocation2 + $0xb0] sm:$0xff]   ;;  %v1345_v20 = vld [vmem:[#allocation2 + $0x38] sm:$0xff]   ;;  %v1347_v22 = vld [vmem:[#allocation2 + $0x40] sm:$0xff]  }
  0x2d   :  { %1254 = vmatpush3.bf16.msra.mxu0 %v392_v6  ;;  %1322 = vmatpush3.bf16.msra.mxu1 %v392_v6  ;;  %v1346_v21 = vld [vmem:[#allocation2 + $0xb8] sm:$0xff]   ;;  %v1348_v23 = vld [vmem:[#allocation2 + $0xc0] sm:$0xff]   ;;  %v1349_v24 = vld [vmem:[#allocation2 + $0x48] sm:$0xff]  }
  0x2e   :  { %v1350_v25 = vld [vmem:[#allocation2 + $0xc8] sm:$0xff]   ;;  %v1351_v26 = vld [vmem:[#allocation2 + $0x50] sm:$0xff]   ;;  %v1353_v28 = vld [vmem:[#allocation2 + $0x58] sm:$0xff]  }
  0x2f   :  { %v1352_v27 = vld [vmem:[#allocation2 + $0xd0] sm:$0xff]   ;;  %v1354_v29 = vld [vmem:[#allocation2 + $0xd8] sm:$0xff]   ;;  %v1355_v30 = vld [vmem:[#allocation2 + $0x60] sm:$0xff]  }
  0x30   :  { %1256 = vmatmul.mubr.msk.bf16.vlgmr.msra.gmra.mrb[0].mxu0 %vm290_vm2, %v1333_v8  ;;  %1288 = vmatmul.mubr.msk.bf16.vlgmr.msra.gmra.mrb[0].mxu1 %vm290_vm2, %v1334_v9  ;;  %v1356_v31 = vld [vmem:[#allocation2 + $0xe0] sm:$0xff]   ;;  %v1357_v32 = vld [vmem:[#allocation2 + $0x68] sm:$0xff]   ;;  %v1359_v34 = vld [vmem:[#allocation2 + $0x70] sm:$0xff]  }
  0x31   :  { %1259 = vmatprep.mubr.msk.bf16.mxu0 %vm290_vm2, %v1335_v10  ;;  %1291 = vmatprep.mubr.msk.bf16.mxu1 %vm290_vm2, %v1336_v11  ;;  %v1358_v33 = vld [vmem:[#allocation2 + $0xe8] sm:$0xff]   ;;  %v1360_v35 = vld [vmem:[#allocation2 + $0xf0] sm:$0xff]   ;;  %v1361_v36 = vld [vmem:[#allocation2 + $0x78] sm:$0xff]  }
  0x32   :  { %v1362_v37 = vld [vmem:[#allocation2 + $0xf8] sm:$0xff]   ;;  %v1526_v38 = vld [vmem:[%s1673_s2] ss:$0 sm:$0xff]  ;;  %s1440_s2 = smov [#allocation7]  }
  0x33   :  { %s1009_s11 = sshll.u32 %s1440_s2, 4  ;;  %s1010_s11 = int_to_ptr.vmem [resolvable:$true] %s1009_s11 }
  0x34   :  { %s1407_s12 = scalar_lea.vmem %s1010_s11, 4096  ;;  %p1412_p3 = scmp.lt.s32.totalorder %s1010_s11, %s1010_s11 }
  0x35   :  { %p1408_p2 = scmp.ne.s32.totalorder %s1010_s11, %s1407_s12  ;;  %p1413_p4 = scmp.lt.s32.totalorder %s1407_s12, %s1407_s12 }
  0x37   :  { %p1414_p5 = por %p1413_p4, %p1412_p3 }
  0x38   :  { %1260 = vmatmul.mubr.msk.bf16.gmra.mrb[4].mxu0 %vm290_vm2, %v1337_v12  ;;  %1292 = vmatmul.mubr.msk.bf16.gmra.mrb[4].mxu1 %vm290_vm2, %v1338_v13 }
  0x39   :  { %1263 = vmatprep.mubr.msk.bf16.mxu0 %vm290_vm2, %v1339_v14  ;;  %1295 = vmatprep.mubr.msk.bf16.mxu1 %vm290_vm2, %v1340_v15  ;;  %p1415_p6 = pnand %p1414_p5, %p1408_p2 }
  0x40   :  { %1264 = vmatmul.mubr.msk.bf16.gmra.mrb[8].mxu0 %vm290_vm2, %v1341_v16  ;;  %1296 = vmatmul.mubr.msk.bf16.gmra.mrb[8].mxu1 %vm290_vm2, %v1342_v17 }
  0x41   :  { %1267 = vmatprep.mubr.msk.bf16.mxu0 %vm290_vm2, %v1343_v18  ;;  %1299 = vmatprep.mubr.msk.bf16.mxu1 %vm290_vm2, %v1344_v19 }
  0x48   :  { %1268 = vmatmul.mubr.msk.bf16.gmra.mrb[12].mxu0 %vm290_vm2, %v1345_v20  ;;  %1300 = vmatmul.mubr.msk.bf16.gmra.mrb[12].mxu1 %vm290_vm2, %v1346_v21 }
  0x49   :  { %1271 = vmatprep.mubr.msk.bf16.mxu0 %vm290_vm2, %v1347_v22  ;;  %1303 = vmatprep.mubr.msk.bf16.mxu1 %vm290_vm2, %v1348_v23 }
  0x50   :  { %1272 = vmatmul.mubr.msk.bf16.gmra.mrb[16].mxu0 %vm290_vm2, %v1349_v24  ;;  %1304 = vmatmul.mubr.msk.bf16.gmra.mrb[16].mxu1 %vm290_vm2, %v1350_v25 }
  0x51   :  { %1275 = vmatprep.mubr.msk.bf16.mxu0 %vm290_vm2, %v1351_v26  ;;  %1307 = vmatprep.mubr.msk.bf16.mxu1 %vm290_vm2, %v1352_v27 }
  0x58   :  { %1276 = vmatmul.mubr.msk.bf16.gmra.mrb[20].mxu0 %vm290_vm2, %v1353_v28  ;;  %1308 = vmatmul.mubr.msk.bf16.gmra.mrb[20].mxu1 %vm290_vm2, %v1354_v29 }
  0x59   :  { %1279 = vmatprep.mubr.msk.bf16.mxu0 %vm290_vm2, %v1355_v30  ;;  %1311 = vmatprep.mubr.msk.bf16.mxu1 %vm290_vm2, %v1356_v31 }
  0x60   :  { %1280 = vmatmul.mubr.msk.bf16.gmra.mrb[24].mxu0 %vm290_vm2, %v1357_v32  ;;  %1312 = vmatmul.mubr.msk.bf16.gmra.mrb[24].mxu1 %vm290_vm2, %v1358_v33 }
  0x61   :  { %1283 = vmatprep.mubr.msk.bf16.mxu0 %vm290_vm2, %v1359_v34  ;;  %1315 = vmatprep.mubr.msk.bf16.mxu1 %vm290_vm2, %v1360_v35 }
  0x68   :  { %1284 = vmatmul.mubr.msk.bf16.gmra.mrb[28].mxu0 %vm290_vm2, %v1361_v36  ;;  %1316 = vmatmul.mubr.msk.bf16.gmra.mrb[28].mxu1 %vm290_vm2, %v1362_v37 }
 0x103   :  { %v1257_v39 = vpop.f32.mrb[0].mxu0  ;;  %v1289_v40 = vpop.f32.mrb[0].mxu1 }
 0x104   :  { %v437_v41 = vadd.f32 %v1257_v39, %v1526_v38  ;;  %v565_v42 = vadd.f32 %v1289_v40, %v1526_v38  ;;  %v428_v43 = vpop.f32.mrb[1].mxu0  ;;  %v556_v44 = vpop.f32.mrb[1].mxu1 }
 0x105   :  { %v429_v45 = vadd.f32 %v1526_v38, %v428_v43  ;;  %v557_v46 = vadd.f32 %v1526_v38, %v556_v44  ;;  %v1258_v47 = vpop.f32.mrb[2].mxu0  ;;  %v1290_v48 = vpop.f32.mrb[2].mxu1 }
 0x106   :  { %v1155_v49 = vpack.c.bf16 %v437_v41, %v437_v41  ;;  %v1187_v50 = vpack.c.bf16 %v565_v42, %v565_v42  ;;  %v440_v51 = vadd.f32 %v1258_v47, %v1526_v38  ;;  %v568_v52 = vadd.f32 %v1290_v48, %v1526_v38  ;;  %v431_v53 = vpop.f32.mrb[3].mxu0  ;;  %v559_v54 = vpop.f32.mrb[3].mxu1 }
 0x107   :  { %v1153_v55 = vpack.c.bf16 %v429_v45, %v429_v45  ;;  %v1185_v56 = vpack.c.bf16 %v557_v46, %v557_v46  ;;  %v432_v57 = vadd.f32 %v1526_v38, %v431_v53  ;;  %v560_v58 = vadd.f32 %v1526_v38, %v559_v54 }
 0x108   :  { %942 = vst.msk [vmem:[#allocation7 + $0x8] sm:$0xf] %vm939_vm3, %v1155_v49  ;;  %974 = vst.msk [vmem:[#allocation7 + $0x88] sm:$0xf] %vm939_vm3, %v1187_v50  ;;  %v1156_v59 = vpack.c.bf16 %v440_v51, %v440_v51  ;;  %v1188_v60 = vpack.c.bf16 %v568_v52, %v568_v52 }
 0x109   :  { %940 = vst.msk [vmem:[#allocation7] sm:$0xf] %vm939_vm3, %v1153_v55  ;;  %972 = vst.msk [vmem:[#allocation7 + $0x80] sm:$0xf] %vm939_vm3, %v1185_v56  ;;  %v1154_v61 = vpack.c.bf16 %v432_v57, %v432_v57  ;;  %v1186_v62 = vpack.c.bf16 %v560_v58, %v560_v58 }
 0x10a   :  { %943 = vst.msk [vmem:[#allocation7 + $0xc] sm:$0xf] %vm939_vm3, %v1156_v59  ;;  %975 = vst.msk [vmem:[#allocation7 + $0x8c] sm:$0xf] %vm939_vm3, %v1188_v60 }
 0x10b   :  { %941 = vst.msk [vmem:[#allocation7 + $0x4] sm:$0xf] %vm939_vm3, %v1154_v61  ;;  %973 = vst.msk [vmem:[#allocation7 + $0x84] sm:$0xf] %vm939_vm3, %v1186_v62  ;;  %v1261_v63 = vpop.f32.mrb[4].mxu0  ;;  %v1293_v0 = vpop.f32.mrb[4].mxu1 }
 0x10c   :  { %v453_v1 = vadd.f32 %v1261_v63, %v1526_v38  ;;  %v581_v2 = vadd.f32 %v1293_v0, %v1526_v38  ;;  %v444_v3 = vpop.f32.mrb[5].mxu0  ;;  %v572_v4 = vpop.f32.mrb[5].mxu1 }
 0x10d   :  { %v445_v5 = vadd.f32 %v1526_v38, %v444_v3  ;;  %v573_v6 = vadd.f32 %v1526_v38, %v572_v4  ;;  %v1262_v7 = vpop.f32.mrb[6].mxu0  ;;  %v1294_v8 = vpop.f32.mrb[6].mxu1 }
 0x10e   :  { %v1159_v9 = vpack.c.bf16 %v453_v1, %v453_v1  ;;  %v1191_v10 = vpack.c.bf16 %v581_v2, %v581_v2  ;;  %v456_v11 = vadd.f32 %v1262_v7, %v1526_v38  ;;  %v584_v12 = vadd.f32 %v1294_v8, %v1526_v38  ;;  %v447_v13 = vpop.f32.mrb[7].mxu0  ;;  %v575_v14 = vpop.f32.mrb[7].mxu1 }
 0x10f   :  { %v1157_v15 = vpack.c.bf16 %v445_v5, %v445_v5  ;;  %v1189_v16 = vpack.c.bf16 %v573_v6, %v573_v6  ;;  %v448_v17 = vadd.f32 %v1526_v38, %v447_v13  ;;  %v576_v18 = vadd.f32 %v1526_v38, %v575_v14 }
 0x110   :  { %946 = vst.msk [vmem:[#allocation7 + $0x18] sm:$0xf] %vm939_vm3, %v1159_v9  ;;  %978 = vst.msk [vmem:[#allocation7 + $0x98] sm:$0xf] %vm939_vm3, %v1191_v10  ;;  %v1160_v19 = vpack.c.bf16 %v456_v11, %v456_v11  ;;  %v1192_v20 = vpack.c.bf16 %v584_v12, %v584_v12 }
 0x111   :  { %944 = vst.msk [vmem:[#allocation7 + $0x10] sm:$0xf] %vm939_vm3, %v1157_v15  ;;  %976 = vst.msk [vmem:[#allocation7 + $0x90] sm:$0xf] %vm939_vm3, %v1189_v16  ;;  %v1158_v21 = vpack.c.bf16 %v448_v17, %v448_v17  ;;  %v1190_v22 = vpack.c.bf16 %v576_v18, %v576_v18 }
 0x112   :  { %947 = vst.msk [vmem:[#allocation7 + $0x1c] sm:$0xf] %vm939_vm3, %v1160_v19  ;;  %979 = vst.msk [vmem:[#allocation7 + $0x9c] sm:$0xf] %vm939_vm3, %v1192_v20 }
 0x113   :  { %945 = vst.msk [vmem:[#allocation7 + $0x14] sm:$0xf] %vm939_vm3, %v1158_v21  ;;  %977 = vst.msk [vmem:[#allocation7 + $0x94] sm:$0xf] %vm939_vm3, %v1190_v22  ;;  %v1265_v23 = vpop.f32.mrb[8].mxu0  ;;  %v1297_v24 = vpop.f32.mrb[8].mxu1 }
 0x114   :  { %v469_v25 = vadd.f32 %v1265_v23, %v1526_v38  ;;  %v597_v26 = vadd.f32 %v1297_v24, %v1526_v38  ;;  %v460_v27 = vpop.f32.mrb[9].mxu0  ;;  %v588_v28 = vpop.f32.mrb[9].mxu1 }
 0x115   :  { %v461_v29 = vadd.f32 %v1526_v38, %v460_v27  ;;  %v589_v30 = vadd.f32 %v1526_v38, %v588_v28  ;;  %v1266_v31 = vpop.f32.mrb[10].mxu0  ;;  %v1298_v32 = vpop.f32.mrb[10].mxu1 }
 0x116   :  { %v1163_v33 = vpack.c.bf16 %v469_v25, %v469_v25  ;;  %v1195_v34 = vpack.c.bf16 %v597_v26, %v597_v26  ;;  %v472_v35 = vadd.f32 %v1266_v31, %v1526_v38  ;;  %v600_v36 = vadd.f32 %v1298_v32, %v1526_v38  ;;  %v463_v37 = vpop.f32.mrb[11].mxu0  ;;  %v591_v39 = vpop.f32.mrb[11].mxu1 }
 0x117   :  { %v1161_v40 = vpack.c.bf16 %v461_v29, %v461_v29  ;;  %v1193_v41 = vpack.c.bf16 %v589_v30, %v589_v30  ;;  %v464_v42 = vadd.f32 %v1526_v38, %v463_v37  ;;  %v592_v43 = vadd.f32 %v1526_v38, %v591_v39 }
 0x118   :  { %950 = vst.msk [vmem:[#allocation7 + $0x28] sm:$0xf] %vm939_vm3, %v1163_v33  ;;  %982 = vst.msk [vmem:[#allocation7 + $0xa8] sm:$0xf] %vm939_vm3, %v1195_v34  ;;  %v1164_v44 = vpack.c.bf16 %v472_v35, %v472_v35  ;;  %v1196_v45 = vpack.c.bf16 %v600_v36, %v600_v36 }
 0x119   :  { %948 = vst.msk [vmem:[#allocation7 + $0x20] sm:$0xf] %vm939_vm3, %v1161_v40  ;;  %980 = vst.msk [vmem:[#allocation7 + $0xa0] sm:$0xf] %vm939_vm3, %v1193_v41  ;;  %v1162_v46 = vpack.c.bf16 %v464_v42, %v464_v42  ;;  %v1194_v47 = vpack.c.bf16 %v592_v43, %v592_v43 }
 0x11a   :  { %951 = vst.msk [vmem:[#allocation7 + $0x2c] sm:$0xf] %vm939_vm3, %v1164_v44  ;;  %983 = vst.msk [vmem:[#allocation7 + $0xac] sm:$0xf] %vm939_vm3, %v1196_v45 }
 0x11b   :  { %949 = vst.msk [vmem:[#allocation7 + $0x24] sm:$0xf] %vm939_vm3, %v1162_v46  ;;  %981 = vst.msk [vmem:[#allocation7 + $0xa4] sm:$0xf] %vm939_vm3, %v1194_v47  ;;  %v1269_v48 = vpop.f32.mrb[12].mxu0  ;;  %v1301_v49 = vpop.f32.mrb[12].mxu1 }
 0x11c   :  { %v485_v50 = vadd.f32 %v1269_v48, %v1526_v38  ;;  %v613_v51 = vadd.f32 %v1301_v49, %v1526_v38  ;;  %v476_v52 = vpop.f32.mrb[13].mxu0  ;;  %v604_v53 = vpop.f32.mrb[13].mxu1 }
 0x11d   :  { %v477_v54 = vadd.f32 %v1526_v38, %v476_v52  ;;  %v605_v55 = vadd.f32 %v1526_v38, %v604_v53  ;;  %v1270_v56 = vpop.f32.mrb[14].mxu0  ;;  %v1302_v57 = vpop.f32.mrb[14].mxu1 }
 0x11e   :  { %v1167_v58 = vpack.c.bf16 %v485_v50, %v485_v50  ;;  %v1199_v59 = vpack.c.bf16 %v613_v51, %v613_v51  ;;  %v488_v60 = vadd.f32 %v1270_v56, %v1526_v38  ;;  %v616_v61 = vadd.f32 %v1302_v57, %v1526_v38  ;;  %v479_v62 = vpop.f32.mrb[15].mxu0  ;;  %v607_v63 = vpop.f32.mrb[15].mxu1 }
 0x11f   :  { %v1165_v0 = vpack.c.bf16 %v477_v54, %v477_v54  ;;  %v1197_v1 = vpack.c.bf16 %v605_v55, %v605_v55  ;;  %v480_v2 = vadd.f32 %v1526_v38, %v479_v62  ;;  %v608_v3 = vadd.f32 %v1526_v38, %v607_v63 }
 0x120   :  { %954 = vst.msk [vmem:[#allocation7 + $0x38] sm:$0xf] %vm939_vm3, %v1167_v58  ;;  %986 = vst.msk [vmem:[#allocation7 + $0xb8] sm:$0xf] %vm939_vm3, %v1199_v59  ;;  %v1168_v4 = vpack.c.bf16 %v488_v60, %v488_v60  ;;  %v1200_v5 = vpack.c.bf16 %v616_v61, %v616_v61 }
 0x121   :  { %952 = vst.msk [vmem:[#allocation7 + $0x30] sm:$0xf] %vm939_vm3, %v1165_v0  ;;  %984 = vst.msk [vmem:[#allocation7 + $0xb0] sm:$0xf] %vm939_vm3, %v1197_v1  ;;  %v1166_v6 = vpack.c.bf16 %v480_v2, %v480_v2  ;;  %v1198_v7 = vpack.c.bf16 %v608_v3, %v608_v3 }
 0x122   :  { %955 = vst.msk [vmem:[#allocation7 + $0x3c] sm:$0xf] %vm939_vm3, %v1168_v4  ;;  %987 = vst.msk [vmem:[#allocation7 + $0xbc] sm:$0xf] %vm939_vm3, %v1200_v5 }
 0x123   :  { %953 = vst.msk [vmem:[#allocation7 + $0x34] sm:$0xf] %vm939_vm3, %v1166_v6  ;;  %985 = vst.msk [vmem:[#allocation7 + $0xb4] sm:$0xf] %vm939_vm3, %v1198_v7  ;;  %v1273_v8 = vpop.f32.mrb[16].mxu0  ;;  %v1305_v9 = vpop.f32.mrb[16].mxu1 }
 0x124   :  { %v501_v10 = vadd.f32 %v1273_v8, %v1526_v38  ;;  %v629_v11 = vadd.f32 %v1305_v9, %v1526_v38  ;;  %v492_v12 = vpop.f32.mrb[17].mxu0  ;;  %v620_v13 = vpop.f32.mrb[17].mxu1 }
 0x125   :  { %v493_v14 = vadd.f32 %v1526_v38, %v492_v12  ;;  %v621_v15 = vadd.f32 %v1526_v38, %v620_v13  ;;  %v1274_v16 = vpop.f32.mrb[18].mxu0  ;;  %v1306_v17 = vpop.f32.mrb[18].mxu1 }
 0x126   :  { %v1171_v18 = vpack.c.bf16 %v501_v10, %v501_v10  ;;  %v1203_v19 = vpack.c.bf16 %v629_v11, %v629_v11  ;;  %v504_v20 = vadd.f32 %v1274_v16, %v1526_v38  ;;  %v632_v21 = vadd.f32 %v1306_v17, %v1526_v38  ;;  %v495_v22 = vpop.f32.mrb[19].mxu0  ;;  %v623_v23 = vpop.f32.mrb[19].mxu1 }
 0x127   :  { %v1169_v24 = vpack.c.bf16 %v493_v14, %v493_v14  ;;  %v1201_v25 = vpack.c.bf16 %v621_v15, %v621_v15  ;;  %v496_v26 = vadd.f32 %v1526_v38, %v495_v22  ;;  %v624_v27 = vadd.f32 %v1526_v38, %v623_v23 }
 0x128   :  { %958 = vst.msk [vmem:[#allocation7 + $0x48] sm:$0xf] %vm939_vm3, %v1171_v18  ;;  %990 = vst.msk [vmem:[#allocation7 + $0xc8] sm:$0xf] %vm939_vm3, %v1203_v19  ;;  %v1172_v28 = vpack.c.bf16 %v504_v20, %v504_v20  ;;  %v1204_v29 = vpack.c.bf16 %v632_v21, %v632_v21 }
 0x129   :  { %956 = vst.msk [vmem:[#allocation7 + $0x40] sm:$0xf] %vm939_vm3, %v1169_v24  ;;  %988 = vst.msk [vmem:[#allocation7 + $0xc0] sm:$0xf] %vm939_vm3, %v1201_v25  ;;  %v1170_v30 = vpack.c.bf16 %v496_v26, %v496_v26  ;;  %v1202_v31 = vpack.c.bf16 %v624_v27, %v624_v27 }
 0x12a   :  { %959 = vst.msk [vmem:[#allocation7 + $0x4c] sm:$0xf] %vm939_vm3, %v1172_v28  ;;  %991 = vst.msk [vmem:[#allocation7 + $0xcc] sm:$0xf] %vm939_vm3, %v1204_v29 }
 0x12b   :  { %957 = vst.msk [vmem:[#allocation7 + $0x44] sm:$0xf] %vm939_vm3, %v1170_v30  ;;  %989 = vst.msk [vmem:[#allocation7 + $0xc4] sm:$0xf] %vm939_vm3, %v1202_v31  ;;  %v1277_v32 = vpop.f32.mrb[20].mxu0  ;;  %v1309_v33 = vpop.f32.mrb[20].mxu1 }
 0x12c   :  { %v517_v34 = vadd.f32 %v1277_v32, %v1526_v38  ;;  %v645_v35 = vadd.f32 %v1309_v33, %v1526_v38  ;;  %v508_v36 = vpop.f32.mrb[21].mxu0  ;;  %v636_v37 = vpop.f32.mrb[21].mxu1 }
 0x12d   :  { %v509_v39 = vadd.f32 %v1526_v38, %v508_v36  ;;  %v637_v40 = vadd.f32 %v1526_v38, %v636_v37  ;;  %v1278_v41 = vpop.f32.mrb[22].mxu0  ;;  %v1310_v42 = vpop.f32.mrb[22].mxu1 }
 0x12e   :  { %v1175_v43 = vpack.c.bf16 %v517_v34, %v517_v34  ;;  %v1207_v44 = vpack.c.bf16 %v645_v35, %v645_v35  ;;  %v520_v45 = vadd.f32 %v1278_v41, %v1526_v38  ;;  %v648_v46 = vadd.f32 %v1310_v42, %v1526_v38  ;;  %v511_v47 = vpop.f32.mrb[23].mxu0  ;;  %v639_v48 = vpop.f32.mrb[23].mxu1 }
 0x12f   :  { %v1173_v49 = vpack.c.bf16 %v509_v39, %v509_v39  ;;  %v1205_v50 = vpack.c.bf16 %v637_v40, %v637_v40  ;;  %v512_v51 = vadd.f32 %v1526_v38, %v511_v47  ;;  %v640_v52 = vadd.f32 %v1526_v38, %v639_v48 }
 0x130   :  { %962 = vst.msk [vmem:[#allocation7 + $0x58] sm:$0xf] %vm939_vm3, %v1175_v43  ;;  %994 = vst.msk [vmem:[#allocation7 + $0xd8] sm:$0xf] %vm939_vm3, %v1207_v44  ;;  %v1176_v53 = vpack.c.bf16 %v520_v45, %v520_v45  ;;  %v1208_v54 = vpack.c.bf16 %v648_v46, %v648_v46 }
 0x131   :  { %960 = vst.msk [vmem:[#allocation7 + $0x50] sm:$0xf] %vm939_vm3, %v1173_v49  ;;  %992 = vst.msk [vmem:[#allocation7 + $0xd0] sm:$0xf] %vm939_vm3, %v1205_v50  ;;  %v1174_v55 = vpack.c.bf16 %v512_v51, %v512_v51  ;;  %v1206_v56 = vpack.c.bf16 %v640_v52, %v640_v52 }
 0x132   :  { %963 = vst.msk [vmem:[#allocation7 + $0x5c] sm:$0xf] %vm939_vm3, %v1176_v53  ;;  %995 = vst.msk [vmem:[#allocation7 + $0xdc] sm:$0xf] %vm939_vm3, %v1208_v54 }
 0x133   :  { %961 = vst.msk [vmem:[#allocation7 + $0x54] sm:$0xf] %vm939_vm3, %v1174_v55  ;;  %993 = vst.msk [vmem:[#allocation7 + $0xd4] sm:$0xf] %vm939_vm3, %v1206_v56  ;;  %v1281_v57 = vpop.f32.mrb[24].mxu0  ;;  %v1313_v58 = vpop.f32.mrb[24].mxu1 }
 0x134   :  { %v533_v59 = vadd.f32 %v1281_v57, %v1526_v38  ;;  %v661_v60 = vadd.f32 %v1313_v58, %v1526_v38  ;;  %v524_v61 = vpop.f32.mrb[25].mxu0  ;;  %v652_v62 = vpop.f32.mrb[25].mxu1 }
 0x135   :  { %v525_v63 = vadd.f32 %v1526_v38, %v524_v61  ;;  %v653_v0 = vadd.f32 %v1526_v38, %v652_v62  ;;  %v1282_v1 = vpop.f32.mrb[26].mxu0  ;;  %v1314_v2 = vpop.f32.mrb[26].mxu1 }
 0x136   :  { %v1179_v3 = vpack.c.bf16 %v533_v59, %v533_v59  ;;  %v1211_v4 = vpack.c.bf16 %v661_v60, %v661_v60  ;;  %v536_v5 = vadd.f32 %v1282_v1, %v1526_v38  ;;  %v664_v6 = vadd.f32 %v1314_v2, %v1526_v38  ;;  %v527_v7 = vpop.f32.mrb[27].mxu0  ;;  %v655_v8 = vpop.f32.mrb[27].mxu1 }
 0x137   :  { %v1177_v9 = vpack.c.bf16 %v525_v63, %v525_v63  ;;  %v1209_v10 = vpack.c.bf16 %v653_v0, %v653_v0  ;;  %v528_v11 = vadd.f32 %v1526_v38, %v527_v7  ;;  %v656_v12 = vadd.f32 %v1526_v38, %v655_v8 }
 0x138   :  { %966 = vst.msk [vmem:[#allocation7 + $0x68] sm:$0xf] %vm939_vm3, %v1179_v3  ;;  %998 = vst.msk [vmem:[#allocation7 + $0xe8] sm:$0xf] %vm939_vm3, %v1211_v4  ;;  %v1180_v13 = vpack.c.bf16 %v536_v5, %v536_v5  ;;  %v1212_v14 = vpack.c.bf16 %v664_v6, %v664_v6 }
 0x139   :  { %964 = vst.msk [vmem:[#allocation7 + $0x60] sm:$0xf] %vm939_vm3, %v1177_v9  ;;  %996 = vst.msk [vmem:[#allocation7 + $0xe0] sm:$0xf] %vm939_vm3, %v1209_v10  ;;  %v1178_v15 = vpack.c.bf16 %v528_v11, %v528_v11  ;;  %v1210_v16 = vpack.c.bf16 %v656_v12, %v656_v12 }
 0x13a   :  { %967 = vst.msk [vmem:[#allocation7 + $0x6c] sm:$0xf] %vm939_vm3, %v1180_v13  ;;  %999 = vst.msk [vmem:[#allocation7 + $0xec] sm:$0xf] %vm939_vm3, %v1212_v14 }
 0x13b   :  { %965 = vst.msk [vmem:[#allocation7 + $0x64] sm:$0xf] %vm939_vm3, %v1178_v15  ;;  %997 = vst.msk [vmem:[#allocation7 + $0xe4] sm:$0xf] %vm939_vm3, %v1210_v16  ;;  %v1285_v17 = vpop.f32.mrb[28].mxu0  ;;  %v1317_v18 = vpop.f32.mrb[28].mxu1 }
 0x13c   :  { %v549_v19 = vadd.f32 %v1285_v17, %v1526_v38  ;;  %v677_v20 = vadd.f32 %v1317_v18, %v1526_v38  ;;  %v540_v21 = vpop.f32.mrb[29].mxu0  ;;  %v668_v22 = vpop.f32.mrb[29].mxu1 }
 0x13d   :  { %v541_v23 = vadd.f32 %v1526_v38, %v540_v21  ;;  %v669_v24 = vadd.f32 %v1526_v38, %v668_v22  ;;  %v1286_v25 = vpop.f32.mrb[30].mxu0  ;;  %v1318_v26 = vpop.f32.mrb[30].mxu1 }
 0x13e   :  { %v1183_v27 = vpack.c.bf16 %v549_v19, %v549_v19  ;;  %v1215_v28 = vpack.c.bf16 %v677_v20, %v677_v20  ;;  %v552_v29 = vadd.f32 %v1286_v25, %v1526_v38  ;;  %v680_v30 = vadd.f32 %v1318_v26, %v1526_v38  ;;  %v543_v31 = vpop.f32.mrb[31].mxu0  ;;  %v671_v32 = vpop.f32.mrb[31].mxu1 }
 0x13f   :  { %v1181_v33 = vpack.c.bf16 %v541_v23, %v541_v23  ;;  %v1213_v34 = vpack.c.bf16 %v669_v24, %v669_v24  ;;  %v544_v35 = vadd.f32 %v1526_v38, %v543_v31  ;;  %v672_v36 = vadd.f32 %v1526_v38, %v671_v32 }
 0x140   :  { %970 = vst.msk [vmem:[#allocation7 + $0x78] sm:$0xf] %vm939_vm3, %v1183_v27  ;;  %1002 = vst.msk [vmem:[#allocation7 + $0xf8] sm:$0xf] %vm939_vm3, %v1215_v28  ;;  %v1184_v37 = vpack.c.bf16 %v552_v29, %v552_v29  ;;  %v1216_v39 = vpack.c.bf16 %v680_v30, %v680_v30 }
 0x141   :  { %968 = vst.msk [vmem:[#allocation7 + $0x70] sm:$0xf] %vm939_vm3, %v1181_v33  ;;  %1000 = vst.msk [vmem:[#allocation7 + $0xf0] sm:$0xf] %vm939_vm3, %v1213_v34  ;;  %v1182_v40 = vpack.c.bf16 %v544_v35, %v544_v35  ;;  %v1214_v41 = vpack.c.bf16 %v672_v36, %v672_v36 }
 0x142   :  { %971 = vst.msk [vmem:[#allocation7 + $0x7c] sm:$0xf] %vm939_vm3, %v1184_v37  ;;  %1003 = vst.msk [vmem:[#allocation7 + $0xfc] sm:$0xf] %vm939_vm3, %v1216_v39 }
 0x143   :  { %969 = vst.msk [vmem:[#allocation7 + $0x74] sm:$0xf] %vm939_vm3, %v1182_v40  ;;  %1001 = vst.msk [vmem:[#allocation7 + $0xf4] sm:$0xf] %vm939_vm3, %v1214_v41 }
 0x144   :  { %1418 = shalt.err (!%p1415_p6)
}
 0x145   :  { %s1419_s15 = scalar_lea.hbm %s1674_s3, 4096 }
 0x146   :  { %p1420_p7 = scmp.ne.s32.totalorder %s1674_s3, %s1419_s15  ;;  %p1423_p8 = scmp.lt.u32.totalorder %s1419_s15, %s1674_s3 }
 0x148   :  { %p1425_p9 = pnand %p1423_p8, %p1420_p7 }
 0x14a   :  { %1428 = shalt.err (!%p1425_p9)
}
 0x14b   :  { %1015 = dma.vmem_to_hbm [thread:$0]  %s1010_s11, 4096, %s1674_s3, [#allocation4], %s1436_s22, %s1436_s22, %s1437_s23  }
 0x14c   :  { %1433 = dma.done.wait [#allocation4], 4096  }
 0x14d   :  { %1434 = vsyncadd [#allocation4], 4294963200 }
 0x14e   :  { %1019 = vsyncpa [#allocation3], 1 }
 0x14f   :  { %1020 = vsyncpa [#allocation6], 1 }
 0x150   :  { %1021 = vsyncpa [#allocation4], 1 }

</bundles_post_ra>
